<compile_context>
chip_gen: v7x
topology: tpu7x:2x2x1
jax: 0.10.0
libtpu: 0.0.40
codegen_flags: <defaults>
</compile_context>

<pallas_src>
import jax
import jax.numpy as jnp
from jax import lax
from jax.experimental import pallas as pl
from jax.experimental.pallas import tpu as pltpu

LANES = 128
# 8192 rows x 128 lanes x 4 B = 4 MiB per f32 input block; x2 inputs x2 pipeline
# buffers = 16 MiB live -> comfortably inside the 40 MiB scoped VMEM requested
# below on all generations (v5e/v6e: 128 MiB physical, v7x: 64 MiB physical).
MAX_BLOCK_ROWS = 8192
VMEM_LIMIT_BYTES = 40 * 1024 * 1024


def _make_jaccard_kernel(block_rows: int, blocks_per_core: int,
                         total_rows: int, need_mask: bool):
    """Builds the kernel with static tiling facts baked in (Python ints)."""

    def kernel(x_ref, y_ref, inter_ref, sum_ref, acc_i, acc_s):
        k = pl.program_id(1)              # reduction ("arbitrary") axis

        @pl.when(k == 0)
        def _init():
            acc_i[...] = jnp.zeros_like(acc_i)
            acc_s[...] = jnp.zeros_like(acc_s)

        # Widen inside the kernel only (keeps HBM traffic at native width so
        # bf16 / int8 inputs stream at 2x / 4x fewer bytes).
        x = x_ref[...].astype(jnp.float32)
        y = y_ref[...].astype(jnp.float32)

        def _accumulate(xv, yv):
            # Lane-dense (1, 128) accumulators: per-step reduction is only along
            # the row/sublane axis (vector adds); the cross-lane collapse and
            # the divide are deferred to the wrapper.
            acc_i[...] += jnp.sum(xv * yv, axis=0, keepdims=True)
            acc_s[...] += jnp.sum(xv + yv, axis=0, keepdims=True)

        if not need_mask:
            # Rows divide evenly across cores and blocks: every tile is valid.
            _accumulate(x, y)
        else:
            # Global row offset of this (core, block) tile.
            base = (pl.program_id(0) * blocks_per_core + k) * block_rows

            @pl.when(base + block_rows <= total_rows)
            def _full_tile():
                _accumulate(x, y)

            @pl.when(base + block_rows > total_rows)
            def _partial_tile():
                # Partial (or phantom, clamped) tile: rows past `total_rows`
                # hold unspecified data -> mask to zero (neutral for both sums).
                rid = lax.broadcasted_iota(jnp.int32, (block_rows, LANES), 0)
                valid = (base + rid) < total_rows
                _accumulate(jnp.where(valid, x, 0.0), jnp.where(valid, y, 0.0))

        @pl.when(k == blocks_per_core - 1)
        def _finalize():
            # Emit per-core lane partials; combine + divide happen outside.
            inter_ref[...] = acc_i[...].reshape(1, 1, LANES)
            sum_ref[...] = acc_s[...].reshape(1, 1, LANES)

    return kernel


@jax.jit
def jaccard_similarity(output: jax.Array, target: jax.Array) -> jax.Array:
    assert output.shape == target.shape, (output.shape, target.shape)

    # Flattening a contiguous array is free (no HBM copy).
    x = output.reshape(-1)
    y = target.reshape(-1)
    n = x.shape[0]

    rem = n % LANES
    if rem:
        # Rare fallback (see TODO at top): zero padding is neutral for both
        # sum(x*y) and sum(x+y).  The common 128-divisible case is copy-free.
        x = jnp.pad(x, (0, LANES - rem))
        y = jnp.pad(y, (0, LANES - rem))

    rows = x.shape[0] // LANES
    x2 = x.reshape(rows, LANES)
    y2 = y.reshape(rows, LANES)

    block_rows = min(MAX_BLOCK_ROWS, rows)            # full-dim block if small
    num_blocks_total = -(-rows // block_rows)         # static ceil-div
    num_cores = 2 if num_blocks_total >= 2 else 1     # v7x: 2 TCs; harmless on 1-TC chips
    blocks_per_core = -(-num_blocks_total // num_cores)
    # Mask needed if the last block is partial or a core has a phantom block.
    need_mask = (num_cores * blocks_per_core * block_rows) != rows

    if need_mask:
        # Clamp phantom blocks onto the last real block (garbage is masked in
        # kernel; consecutive identical block indices also skip the re-DMA).
        def in_idx(c, k):
            return (jnp.minimum(c * blocks_per_core + k, num_blocks_total - 1), 0)
    else:
        def in_idx(c, k):
            return (c * blocks_per_core + k, 0)

    kernel = _make_jaccard_kernel(block_rows, blocks_per_core, rows, need_mask)

    part_shape = jax.ShapeDtypeStruct((num_cores, 1, LANES), jnp.float32)
    inter_parts, sum_parts = pl.pallas_call(
        kernel,
        out_shape=(part_shape, part_shape),
        grid_spec=pltpu.PrefetchScalarGridSpec(
            num_scalar_prefetch=0,
            grid=(num_cores, blocks_per_core),
            in_specs=[
                pl.BlockSpec((block_rows, LANES), in_idx),
                pl.BlockSpec((block_rows, LANES), in_idx),
            ],
            out_specs=[
                pl.BlockSpec((1, 1, LANES), lambda c, k: (c, 0, 0)),
                pl.BlockSpec((1, 1, LANES), lambda c, k: (c, 0, 0)),
            ],
            scratch_shapes=[
                pltpu.VMEM((1, LANES), jnp.float32),  # intersection partials
                pltpu.VMEM((1, LANES), jnp.float32),  # sum partials
            ],
        ),
        compiler_params=pltpu.CompilerParams(
            dimension_semantics=("parallel", "arbitrary"),
            vmem_limit_bytes=VMEM_LIMIT_BYTES,
        ),
    )(x2, y2)

    # Tiny cross-core / cross-lane combine + the final divide (matches the
    # PyTorch formula exactly; union == 0 -> NaN/Inf as in torch).
    intersection = jnp.sum(inter_parts)
    total = jnp.sum(sum_parts)
    union = total - intersection
    return intersection / union


if __name__ == "__main__":
    key = jax.random.PRNGKey(0)
    k1, k2 = jax.random.split(key)
    # Small NCHW-like shapes consistent with a segmentation-style output/target.
    output = jax.random.uniform(k1, (2, 4, 16, 16), dtype=jnp.float32)
    target = (jax.random.uniform(k2, (2, 4, 16, 16)) > 0.5).astype(jnp.float32)

    jac = jaccard_similarity(output, target)
    jax.block_until_ready(jac)

    # Reference check in plain JAX.
    inter = jnp.sum(output * target)
    union = jnp.sum(output + target) - inter
    ref = inter / union
    assert jnp.allclose(jac, ref, rtol=1e-5, atol=1e-6), (jac, ref)

    print("KERNEL_OK")
</pallas_src>

<mosaic_0001>
module attributes {stable_mosaic.version = 11 : i64} {
  func.func @kernel(%arg0: i32, %arg1: i32, %arg2: memref<16x128xf32, #tpu.memory_space<vmem>>, %arg3: memref<16x128xf32, #tpu.memory_space<vmem>>, %arg4: memref<1x1x128xf32, #tpu.memory_space<vmem>>, %arg5: memref<1x1x128xf32, #tpu.memory_space<vmem>>, %arg6: memref<1x128xf32, #tpu.memory_space<vmem>>, %arg7: memref<1x128xf32, #tpu.memory_space<vmem>>) attributes {dimension_semantics = [#tpu.dimension_semantics<parallel>, #tpu.dimension_semantics<arbitrary>], iteration_bounds = array<i64: 1, 1>, scalar_prefetch = 0 : i64, scratch_operands = 2 : i64, tpu.core_type = #tpu.core_type<tc>, window_params = [{transform_indices = @transform_0, window_bounds = array<i64: 16, 128>}, {transform_indices = @transform_1, window_bounds = array<i64: 16, 128>}, {transform_indices = @transform_2, window_bounds = array<i64: 1, 1, 128>}, {transform_indices = @transform_3, window_bounds = array<i64: 1, 1, 128>}]} {
    %c0_i32 = arith.constant 0 : i32
    %0 = arith.cmpi eq, %arg1, %c0_i32 : i32
    %1 = arith.extui %0 : i1 to i32
    %c0_i32_0 = arith.constant 0 : i32
    %2 = arith.cmpi ne, %1, %c0_i32_0 : i32
    scf.if %2 {
      %cst_15 = arith.constant 0.000000e+00 : f32
      %20 = vector.broadcast %cst_15 : f32 to vector<1x128xf32>
      %c0_16 = arith.constant 0 : index
      %c0_17 = arith.constant 0 : index
      %21 = vector.load %arg6[%c0_16, %c0_17] : memref<1x128xf32, #tpu.memory_space<vmem>>, vector<1x128xf32>
      tpu.vector_store %arg6[%c0_16, %c0_17], %20 {strides = array<i32>} : memref<1x128xf32, #tpu.memory_space<vmem>>, vector<1x128xf32>,
      %cst_18 = arith.constant 0.000000e+00 : f32
      %22 = vector.broadcast %cst_18 : f32 to vector<1x128xf32>
      %c0_19 = arith.constant 0 : index
      %c0_20 = arith.constant 0 : index
      %23 = vector.load %arg7[%c0_19, %c0_20] : memref<1x128xf32, #tpu.memory_space<vmem>>, vector<1x128xf32>
      tpu.vector_store %arg7[%c0_19, %c0_20], %22 {strides = array<i32>} : memref<1x128xf32, #tpu.memory_space<vmem>>, vector<1x128xf32>,
    } else {
    }
    %c0 = arith.constant 0 : index
    %c0_1 = arith.constant 0 : index
    %3 = vector.load %arg2[%c0, %c0_1] : memref<16x128xf32, #tpu.memory_space<vmem>>, vector<16x128xf32>
    %c0_2 = arith.constant 0 : index
    %c0_3 = arith.constant 0 : index
    %4 = vector.load %arg3[%c0_2, %c0_3] : memref<16x128xf32, #tpu.memory_space<vmem>>, vector<16x128xf32>
    %c0_4 = arith.constant 0 : index
    %c0_5 = arith.constant 0 : index
    %5 = vector.load %arg6[%c0_4, %c0_5] : memref<1x128xf32, #tpu.memory_space<vmem>>, vector<1x128xf32>
    %6 = arith.mulf %3, %4 : vector<16x128xf32>
    %cst = arith.constant dense<0.000000e+00> : vector<128xf32>
    %7 = vector.multi_reduction <add>, %6, %cst [0] : vector<16x128xf32> to vector<128xf32>
    %8 = vector.shape_cast %7 : vector<128xf32> to vector<1x128xf32>
    %9 = arith.addf %5, %8 : vector<1x128xf32>
    %c0_6 = arith.constant 0 : index
    %c0_7 = arith.constant 0 : index
    %10 = vector.load %arg6[%c0_6, %c0_7] : memref<1x128xf32, #tpu.memory_space<vmem>>, vector<1x128xf32>
    tpu.vector_store %arg6[%c0_6, %c0_7], %9 {strides = array<i32>} : memref<1x128xf32, #tpu.memory_space<vmem>>, vector<1x128xf32>,
    %c0_8 = arith.constant 0 : index
    %c0_9 = arith.constant 0 : index
    %11 = vector.load %arg7[%c0_8, %c0_9] : memref<1x128xf32, #tpu.memory_space<vmem>>, vector<1x128xf32>
    %12 = arith.addf %3, %4 : vector<16x128xf32>
    %cst_10 = arith.constant dense<0.000000e+00> : vector<128xf32>
    %13 = vector.multi_reduction <add>, %12, %cst_10 [0] : vector<16x128xf32> to vector<128xf32>
    %14 = vector.shape_cast %13 : vector<128xf32> to vector<1x128xf32>
    %15 = arith.addf %11, %14 : vector<1x128xf32>
    %c0_11 = arith.constant 0 : index
    %c0_12 = arith.constant 0 : index
    %16 = vector.load %arg7[%c0_11, %c0_12] : memref<1x128xf32, #tpu.memory_space<vmem>>, vector<1x128xf32>
    tpu.vector_store %arg7[%c0_11, %c0_12], %15 {strides = array<i32>} : memref<1x128xf32, #tpu.memory_space<vmem>>, vector<1x128xf32>,
    %c0_i32_13 = arith.constant 0 : i32
    %17 = arith.cmpi eq, %arg1, %c0_i32_13 : i32
    %18 = arith.extui %17 : i1 to i32
    %c0_i32_14 = arith.constant 0 : i32
    %19 = arith.cmpi ne, %18, %c0_i32_14 : i32
    scf.if %19 {
      %c0_15 = arith.constant 0 : index
      %c0_16 = arith.constant 0 : index
      %20 = vector.load %arg6[%c0_15, %c0_16] : memref<1x128xf32, #tpu.memory_space<vmem>>, vector<1x128xf32>
      %21 = vector.shape_cast %20 : vector<1x128xf32> to vector<1x1x128xf32>
      %c0_17 = arith.constant 0 : index
      %c0_18 = arith.constant 0 : index
      %c0_19 = arith.constant 0 : index
      %22 = vector.load %arg4[%c0_17, %c0_18, %c0_19] : memref<1x1x128xf32, #tpu.memory_space<vmem>>, vector<1x1x128xf32>
      tpu.vector_store %arg4[%c0_17, %c0_18, %c0_19], %21 {strides = array<i32>} : memref<1x1x128xf32, #tpu.memory_space<vmem>>, vector<1x1x128xf32>,
      %c0_20 = arith.constant 0 : index
      %c0_21 = arith.constant 0 : index
      %23 = vector.load %arg7[%c0_20, %c0_21] : memref<1x128xf32, #tpu.memory_space<vmem>>, vector<1x128xf32>
      %24 = vector.shape_cast %23 : vector<1x128xf32> to vector<1x1x128xf32>
      %c0_22 = arith.constant 0 : index
      %c0_23 = arith.constant 0 : index
      %c0_24 = arith.constant 0 : index
      %25 = vector.load %arg5[%c0_22, %c0_23, %c0_24] : memref<1x1x128xf32, #tpu.memory_space<vmem>>, vector<1x1x128xf32>
      tpu.vector_store %arg5[%c0_22, %c0_23, %c0_24], %24 {strides = array<i32>} : memref<1x1x128xf32, #tpu.memory_space<vmem>>, vector<1x1x128xf32>,
    } else {
    }
    return
  }
  func.func @transform_0(%arg0: i32, %arg1: i32) -> (i32, i32) {
    %c1_i32 = arith.constant 1 : i32
    %0 = arith.muli %arg0, %c1_i32 : i32
    %1 = arith.addi %0, %arg1 : i32
    %c0_i32 = arith.constant 0 : i32
    %c0_i32_0 = arith.constant 0 : i32
    return %1, %c0_i32 : i32, i32
  }
  func.func @transform_1(%arg0: i32, %arg1: i32) -> (i32, i32) {
    %c1_i32 = arith.constant 1 : i32
    %0 = arith.muli %arg0, %c1_i32 : i32
    %1 = arith.addi %0, %arg1 : i32
    %c0_i32 = arith.constant 0 : i32
    %c0_i32_0 = arith.constant 0 : i32
    return %1, %c0_i32 : i32, i32
  }
  func.func @transform_2(%arg0: i32, %arg1: i32) -> (i32, i32, i32) {
    %c0_i32 = arith.constant 0 : i32
    %c0_i32_0 = arith.constant 0 : i32
    %c0_i32_1 = arith.constant 0 : i32
    return %arg0, %c0_i32, %c0_i32_0 : i32, i32, i32
  }
  func.func @transform_3(%arg0: i32, %arg1: i32) -> (i32, i32, i32) {
    %c0_i32 = arith.constant 0 : i32
    %c0_i32_0 = arith.constant 0 : i32
    %c0_i32_1 = arith.constant 0 : i32
    return %arg0, %c0_i32, %c0_i32_0 : i32, i32, i32
  }
}

</mosaic_0001>

<bundles_post_ra>
// kernel: jaccard_similarity.1
= control target key start
LH: loop header
LB: loop body
LE: loop exit
PB: predicated region body
PF: predicated region fallthrough
CT: control target
= control target key end

     0   :  { %v119_v0 = vmov 0.0   ;;  %s158_s0 = inlined_call_operand.vmem [shape: f32[16,128], index: 0, kind: input, shape index: {}]   ;;  %s159_s1 = inlined_call_operand.vmem [shape: f32[16,128], index: 1, kind: input, shape index: {}]   ;;  %s160_s2 = inlined_call_operand.vmem [shape: f32[1,1,128], index: 2, kind: output, shape index: {0}]   ;;  %s161_s3 = inlined_call_operand.vmem [shape: f32[1,1,128], index: 3, kind: output, shape index: {1}]  }
   0x1   :  { %61 = vst [vmem:[#allocation2] sm:$0x1] %v119_v0  ;;  %62 = vst [vmem:[#allocation3] sm:$0x1] %v119_v0  ;;  %v63_v1 = vld [vmem:[%s158_s0] sm:$0xff]  ;;  %v64_v2 = vld [vmem:[%s158_s0 + $0x8] sm:$0xff] }
   0x2   :  { %v65_v3 = vld [vmem:[%s159_s1] sm:$0xff]  ;;  %v66_v4 = vld [vmem:[%s159_s1 + $0x8] sm:$0xff] }
   0x3   :  { %v68_v5 = vmul.f32 %v65_v3, %v63_v1  ;;  %v80_v6 = vadd.f32 %v65_v3, %v63_v1  ;;  %v69_v7 = vmul.f32 %v66_v4, %v64_v2  ;;  %v81_v8 = vadd.f32 %v66_v4, %v64_v2 }
   0x5   :  { %v70_v9 = vadd.f32 %v69_v7, %v68_v5  ;;  %v82_v10 = vadd.f32 %v81_v8, %v80_v6 }
   0x7   :  { %v71_v11 = vrot.slane %v70_v9, 4  ;;  %v83_v12 = vrot.slane %v82_v10, 4 }
   0x8   :  { %v67_v21 = vld [vmem:[#allocation2] sm:$0x1]  ;;  %v79_v22 = vld [vmem:[#allocation3] sm:$0x1] }
   0x9   :  { %v72_v13 = vadd.f32 %v71_v11, %v70_v9  ;;  %v84_v14 = vadd.f32 %v83_v12, %v82_v10 }
   0xb   :  { %v73_v15 = vrot.slane %v72_v13, 2  ;;  %v85_v16 = vrot.slane %v84_v14, 2 }
   0xd   :  { %v74_v17 = vadd.f32 %v73_v15, %v72_v13  ;;  %v86_v18 = vadd.f32 %v85_v16, %v84_v14 }
   0xf   :  { %v75_v19 = vrot.slane %v74_v17, 1  ;;  %v87_v20 = vrot.slane %v86_v18, 1 }
  0x11   :  { %v76_v23 = vadd.f32 %v75_v19, %v74_v17  ;;  %v88_v24 = vadd.f32 %v87_v20, %v86_v18 }
  0x13   :  { %v77_v25 = vadd.f32 %v76_v23, %v67_v21  ;;  %v89_v26 = vadd.f32 %v88_v24, %v79_v22 }
  0x15   :  { %78 = vst [vmem:[#allocation2] sm:$0x1] %v77_v25  ;;  %90 = vst [vmem:[#allocation3] sm:$0x1] %v89_v26 }
  0x1c   :  { %v94_v27 = vld [vmem:[#allocation2] sm:$0x1]  ;;  %v96_v28 = vld [vmem:[#allocation3] sm:$0x1] }
  0x1d   :  { %95 = vst [vmem:[%s160_s2] sm:$0x1] %v94_v27  ;;  %97 = vst [vmem:[%s161_s3] sm:$0x1] %v96_v28 }

</bundles_post_ra>
